<compile_context>
chip_gen: v7x
topology: tpu7x:2x2x1
jax: 0.10.0
libtpu: 0.0.40
codegen_flags: <defaults>
</compile_context>

<pallas_src>
import functools

import numpy as np
import jax
import jax.numpy as jnp
from jax.experimental import pallas as pl
from jax.experimental.pallas import tpu as pltpu


def adain_kernel(x_ref, a_ref, b_ref, o_ref, *, eps):
    # x_ref : (nB, tC, HW)  activations, H*W lane-dense
    # a_ref : (nB, tC, 1)   precomputed AdaIN scale per (sample, channel)
    # b_ref : (nB, tC, 1)   precomputed AdaIN bias  per (sample, channel)
    x = x_ref[...].astype(jnp.float32)                          # stats always in f32

    mean = jnp.mean(x, axis=-1, keepdims=True)                  # (nB, tC, 1)
    xc = x - mean                                               # reused for var (two-pass)
    var = jnp.mean(xc * xc, axis=-1, keepdims=True)             # biased variance

    gain = a_ref[...] * jax.lax.rsqrt(var + eps)                # fold norm + affine
    o_ref[...] = (xc * gain + b_ref[...]).astype(o_ref.dtype)   # 1 mul + 1 add per element


def _choose_block(N, C, HW, itemsize, budget_bytes=3 << 20):
    """Pick (samples/block, channels/block), keeping the full HW row per channel.

    ~3 MiB per block keeps the double-buffered input + output streams (~12 MiB) inside
    the default scoped-VMEM limit on v5e (16 MiB) as well as v6e/v7x (32 MiB).
    """
    bytes_per_row = HW * itemsize
    rows_budget = max(1, budget_bytes // bytes_per_row)
    if C <= rows_budget:
        tC = C                                                  # full channel dim
        nB = max(1, min(N, rows_budget // C))                   # batch samples if cheap
    else:
        tC = min(max(8, (rows_budget // 8) * 8), C)             # sublane-aligned tile
        nB = 1
    return nB, tC


def adain_forward(x, w, ws_w, ws_b, wb_w, wb_b, *, eps=1e-8):
    """x: (N, C, H, W) NCHW; w: (N, Wd, 1, 1). Returns (N, C, H, W)."""
    N, C, H, W = x.shape
    Wd = w.shape[1]
    HW = H * W
    w_scale = 1.0 / np.sqrt(Wd * 1 * 1)                         # WSConv2d scale, gain=1, k=1

    # Hoisted style transforms: one batched matmul for all samples & both transforms.
    w2 = w.reshape(N, Wd).astype(jnp.float32)                   # (N, Wd)
    w_cat = jnp.concatenate(
        [ws_w.reshape(C, Wd), wb_w.reshape(C, Wd)], axis=0).T   # (Wd, 2C)
    b_cat = jnp.concatenate([ws_b, wb_b], axis=0).astype(jnp.float32)   # (2C,)
    sb = jnp.dot(w2, w_cat, preferred_element_type=jnp.float32) * w_scale + b_cat
    scale = sb[:, :C].reshape(N, C, 1)                          # (N, C, 1) f32
    bias = sb[:, C:].reshape(N, C, 1)                           # (N, C, 1) f32

    # Native layout: collapsing contiguous spatial dims is free (no transpose).
    x_k = x.reshape(N, C, HW)

    nB, tC = _choose_block(N, C, HW, x.dtype.itemsize)
    grid = (pl.cdiv(N, nB), pl.cdiv(C, tC))

    kernel = functools.partial(adain_kernel, eps=float(eps))

    # Advisory cost: this kernel is HBM-bandwidth-bound (read x once, write out once).
    nelem = N * C * HW
    cost = pl.CostEstimate(
        flops=6 * nelem,
        transcendentals=N * C,
        bytes_accessed=2 * nelem * x.dtype.itemsize + 2 * N * C * 4,
    )

    out = pl.pallas_call(
        kernel,
        out_shape=jax.ShapeDtypeStruct((N, C, HW), x.dtype),
        grid=grid,
        in_specs=[
            pl.BlockSpec((nB, tC, HW), lambda i, j: (i, j, 0)),  # x (lane-dense HW)
            pl.BlockSpec((nB, tC, 1), lambda i, j: (i, j, 0)),   # precomputed scale
            pl.BlockSpec((nB, tC, 1), lambda i, j: (i, j, 0)),   # precomputed bias
        ],
        out_specs=pl.BlockSpec((nB, tC, HW), lambda i, j: (i, j, 0)),
        compiler_params=pltpu.CompilerParams(
            dimension_semantics=("parallel", "parallel")),
        cost_estimate=cost,
    )(x_k, scale, bias)

    return out.reshape(N, C, H, W)


def adain_reference(x, w, ws_w, ws_b, wb_w, wb_b, *, eps=1e-8):
    """Pure-JAX reference matching the PyTorch module."""
    mean = jnp.mean(x, axis=(2, 3), keepdims=True)
    var = jnp.var(x, axis=(2, 3), keepdims=True)                # biased, like F.instance_norm
    xn = (x - mean) / jnp.sqrt(var + eps)
    C = ws_w.shape[0]
    Wd = w.shape[1]
    sc = 1.0 / np.sqrt(Wd)
    scale = jnp.einsum("nkhw,ck->nchw", w, ws_w.reshape(C, Wd)) * sc + ws_b.reshape(1, C, 1, 1)
    bias = jnp.einsum("nkhw,ck->nchw", w, wb_w.reshape(C, Wd)) * sc + wb_b.reshape(1, C, 1, 1)
    return scale * xn + bias


if __name__ == "__main__":
    # Small shapes consistent with the module: AdaIN(dim=4, w_dim=8), x spatial 16x16,
    # style map w is (N, w_dim, 1, 1) as in StyleGAN usage.
    N, dim, w_dim, H, W = 2, 4, 8, 16, 16

    key = jax.random.PRNGKey(0)
    kx, kw, kws, kwb = jax.random.split(key, 4)

    x = jax.random.normal(kx, (N, dim, H, W), dtype=jnp.float32)
    w = jax.random.normal(kw, (N, w_dim, 1, 1), dtype=jnp.float32)

    # WSConv2d(__init__): weight ~ N(0,1) of shape (out, in, 1, 1), bias = zeros.
    ws_weight = jax.random.normal(kws, (dim, w_dim, 1, 1), dtype=jnp.float32)
    ws_bias = jnp.zeros((dim,), dtype=jnp.float32)
    wb_weight = jax.random.normal(kwb, (dim, w_dim, 1, 1), dtype=jnp.float32)
    wb_bias = jnp.zeros((dim,), dtype=jnp.float32)

    # jit the whole forward: style matmul + Pallas kernel run as a single XLA program.
    adain = jax.jit(adain_forward)
    out = jax.block_until_ready(adain(x, w, ws_weight, ws_bias, wb_weight, wb_bias))

    ref = adain_reference(x, w, ws_weight, ws_bias, wb_weight, wb_bias)
    np.testing.assert_allclose(np.asarray(out), np.asarray(ref), rtol=1e-5, atol=1e-5)

    print("KERNEL_OK")
</pallas_src>

<mosaic_0001>
module attributes {stable_mosaic.version = 11 : i64} {
  func.func @adain_kernel(%arg0: i32, %arg1: i32, %arg2: memref<2x4x256xf32, #tpu.memory_space<vmem>>, %arg3: memref<2x4x1xf32, #tpu.memory_space<vmem>>, %arg4: memref<2x4x1xf32, #tpu.memory_space<vmem>>, %arg5: memref<2x4x256xf32, #tpu.memory_space<vmem>>) attributes {dimension_semantics = [#tpu.dimension_semantics<parallel>, #tpu.dimension_semantics<parallel>], iteration_bounds = array<i64: 1, 1>, scalar_prefetch = 0 : i64, scratch_operands = 0 : i64, tpu.core_type = #tpu.core_type<tc>, window_params = [{transform_indices = @transform_0, window_bounds = array<i64: 2, 4, 256>}, {transform_indices = @transform_1, window_bounds = array<i64: 2, 4, 1>}, {transform_indices = @transform_2, window_bounds = array<i64: 2, 4, 1>}, {transform_indices = @transform_3, window_bounds = array<i64: 2, 4, 256>}]} {
    %c0 = arith.constant 0 : index
    %c0_0 = arith.constant 0 : index
    %c0_1 = arith.constant 0 : index
    %0 = vector.load %arg2[%c0, %c0_0, %c0_1] : memref<2x4x256xf32, #tpu.memory_space<vmem>>, vector<2x4x256xf32>
    %cst = arith.constant dense<0.000000e+00> : vector<2x4xf32>
    %1 = vector.multi_reduction <add>, %0, %cst [2] : vector<2x4x256xf32> to vector<2x4xf32>
    %2 = vector.shape_cast %1 : vector<2x4xf32> to vector<2x4x1xf32>
    %cst_2 = arith.constant 2.560000e+02 : f32
    %3 = vector.broadcast %cst_2 : f32 to vector<2x4x1xf32>
    %4 = arith.divf %2, %3 : vector<2x4x1xf32>
    %5 = vector.broadcast %4 : vector<2x4x1xf32> to vector<2x4x256xf32>
    %6 = arith.subf %0, %5 : vector<2x4x256xf32>
    %7 = arith.mulf %6, %6 : vector<2x4x256xf32>
    %cst_3 = arith.constant dense<0.000000e+00> : vector<2x4xf32>
    %8 = vector.multi_reduction <add>, %7, %cst_3 [2] : vector<2x4x256xf32> to vector<2x4xf32>
    %9 = vector.shape_cast %8 : vector<2x4xf32> to vector<2x4x1xf32>
    %cst_4 = arith.constant 2.560000e+02 : f32
    %10 = vector.broadcast %cst_4 : f32 to vector<2x4x1xf32>
    %11 = arith.divf %9, %10 : vector<2x4x1xf32>
    %c0_5 = arith.constant 0 : index
    %c0_6 = arith.constant 0 : index
    %c0_7 = arith.constant 0 : index
    %12 = vector.load %arg3[%c0_5, %c0_6, %c0_7] : memref<2x4x1xf32, #tpu.memory_space<vmem>>, vector<2x4x1xf32>
    %cst_8 = arith.constant 9.99999993E-9 : f32
    %13 = vector.broadcast %cst_8 : f32 to vector<2x4x1xf32>
    %14 = arith.addf %11, %13 : vector<2x4x1xf32>
    %15 = math.rsqrt %14 : vector<2x4x1xf32>
    %16 = arith.mulf %12, %15 : vector<2x4x1xf32>
    %17 = vector.broadcast %16 : vector<2x4x1xf32> to vector<2x4x256xf32>
    %18 = arith.mulf %6, %17 : vector<2x4x256xf32>
    %c0_9 = arith.constant 0 : index
    %c0_10 = arith.constant 0 : index
    %c0_11 = arith.constant 0 : index
    %19 = vector.load %arg4[%c0_9, %c0_10, %c0_11] : memref<2x4x1xf32, #tpu.memory_space<vmem>>, vector<2x4x1xf32>
    %20 = vector.broadcast %19 : vector<2x4x1xf32> to vector<2x4x256xf32>
    %21 = arith.addf %18, %20 : vector<2x4x256xf32>
    %c0_12 = arith.constant 0 : index
    %c0_13 = arith.constant 0 : index
    %c0_14 = arith.constant 0 : index
    %22 = vector.load %arg5[%c0_12, %c0_13, %c0_14] : memref<2x4x256xf32, #tpu.memory_space<vmem>>, vector<2x4x256xf32>
    tpu.vector_store %arg5[%c0_12, %c0_13, %c0_14], %21 {strides = array<i32>} : memref<2x4x256xf32, #tpu.memory_space<vmem>>, vector<2x4x256xf32>,
    return
  }
  func.func @transform_0(%arg0: i32, %arg1: i32) -> (i32, i32, i32) {
    %c0_i32 = arith.constant 0 : i32
    %c0_i32_0 = arith.constant 0 : i32
    return %arg0, %arg1, %c0_i32 : i32, i32, i32
  }
  func.func @transform_1(%arg0: i32, %arg1: i32) -> (i32, i32, i32) {
    %c0_i32 = arith.constant 0 : i32
    %c0_i32_0 = arith.constant 0 : i32
    return %arg0, %arg1, %c0_i32 : i32, i32, i32
  }
  func.func @transform_2(%arg0: i32, %arg1: i32) -> (i32, i32, i32) {
    %c0_i32 = arith.constant 0 : i32
    %c0_i32_0 = arith.constant 0 : i32
    return %arg0, %arg1, %c0_i32 : i32, i32, i32
  }
  func.func @transform_3(%arg0: i32, %arg1: i32) -> (i32, i32, i32) {
    %c0_i32 = arith.constant 0 : i32
    %c0_i32_0 = arith.constant 0 : i32
    return %arg0, %arg1, %c0_i32 : i32, i32, i32
  }
}

</mosaic_0001>

<bundles_post_ra>
// kernel: adain_forward.1
= control target key start
LH: loop header
LB: loop body
LE: loop exit
PB: predicated region body
PF: predicated region fallthrough
CT: control target
= control target key end

     0   :  { %vm22_vm0 = vcmask 1043456   ;;  %v154_v10 = vmov 839922192   ;;  %v41_v12 = vlaneseq  ;;  %v155_v34 = vmov 0   ;;  %s208_s0 = inlined_call_operand.vmem [shape: f32[2,4,256], index: 0, kind: input, shape index: {}]   ;;  %s209_s2 = inlined_call_operand.vmem [shape: f32[2,4,1], index: 2, kind: input, shape index: {}]   ;;  %s210_s1 = inlined_call_operand.vmem [shape: f32[2,4,1], index: 1, kind: input, shape index: {}]   ;;  %s211_s3 = inlined_call_operand.vmem [shape: f32[2,4,256], index: 3, kind: output, shape index: {}]  }
   0x1   :  { %v14_v0 = vld [vmem:[%s208_s0] sm:$0xff]  ;;  %v15_v1 = vld [vmem:[%s208_s0 + $0x8] sm:$0xff]  ;;  %v39_v11 = vunpack.c.l.s4 %v154_v10  ;;  %147 = vset.pattern.permute.xlu1 %v155_v34  ;;  %146 = vset.pattern.permute.xlu0 %v155_v34 }
   0x2   :  { %v18_v2 = vcombine.high %v14_v0, %v14_v0  ;;  %v23_v3 = vsel %vm22_vm0, %v14_v0, 0.0  ;;  %v19_v4 = vcombine.high %v15_v1, %v15_v1  ;;  %v28_v6 = vsel %vm22_vm0, %v15_v1, 0.0  ;;  %v110_v35 = vld [vmem:[%s209_s2] sm:$0xf]  ;;  %v77_v45 = vld [vmem:[%s210_s1 + $0x4] sm:$0xf] }
   0x3   :  { %v40_v13 = vunpack.c.0.s8 %v39_v11  ;;  %v42_v14 = vshrl.u32 %v41_v12, 7  ;;  %v76_v42 = vld [vmem:[%s210_s1] sm:$0xf]  ;;  %v111_v48 = vld [vmem:[%s209_s2 + $0x4] sm:$0xf] }
   0x4   :  { %v24_v5 = vsel %vm22_vm0, %v18_v2, 0.0  ;;  %v29_v7 = vsel %vm22_vm0, %v19_v4, 0.0 }
   0x5   :  { %v25_v8 = vadd.f32 %v24_v5, %v23_v3  ;;  %v30_v9 = vadd.f32 %v29_v7, %v28_v6  ;;  %v43_v15 = vsub.s32 %v40_v13, %v42_v14 }
   0x7   :  { %26 = vadd.xlane.f32.xlu0 %v25_v8 }
   0xb   :  { %31 = vadd.xlane.f32.xlu0 %v30_v9 }
  0x94   :  { %v27_v16 = vpop.xlane.xlu0 %26 }
  0x95   :  { %v34_v17 = vmul.f32 0.00390625, %v27_v16 }
  0x97   :  { %v44_v18 = vrot.slane %v34_v17, %v43_v15 }
  0x98   :  { %v32_v19 = vpop.xlane.xlu0 %31 }
  0x99   :  { %v54_v20 = vsub.f32 %v14_v0, %v44_v18  ;;  %v35_v21 = vmul.f32 0.00390625, %v32_v19 }
  0x9b   :  { %v51_v22 = vrot.slane %v35_v21, %v43_v15  ;;  %v56_v23 = vmul.f32 %v54_v20, %v54_v20 }
  0x9d   :  { %v55_v24 = vsub.f32 %v15_v1, %v51_v22  ;;  %v60_v25 = vcombine.high %v56_v23, %v56_v23  ;;  %v64_v26 = vsel %vm22_vm0, %v56_v23, 0.0 }
  0x9f   :  { %v65_v27 = vsel %vm22_vm0, %v60_v25, 0.0  ;;  %v57_v28 = vmul.f32 %v55_v24, %v55_v24 }
  0xa0   :  { %v66_v29 = vadd.f32 %v65_v27, %v64_v26 }
  0xa1   :  { %v61_v30 = vcombine.high %v57_v28, %v57_v28  ;;  %v69_v31 = vsel %vm22_vm0, %v57_v28, 0.0 }
  0xa2   :  { %67 = vadd.xlane.f32.xlu1 %v66_v29 }
  0xa3   :  { %v70_v32 = vsel %vm22_vm0, %v61_v30, 0.0 }
  0xa4   :  { %v71_v33 = vadd.f32 %v70_v32, %v69_v31 }
  0xa6   :  { %72 = vadd.xlane.f32.xlu1 %v71_v33 }
  0xb7   :  { %114 = vperm.xlu1 %147, %v110_v35  }
 0x12f   :  { %v68_v36 = vpop.xlane.xlu1 %67 }
 0x130   :  { %v74_v37 = vmul.f32 0.00390625, %v68_v36 }
 0x132   :  { %v78_v38 = vadd.f32 1e-08, %v74_v37 }
 0x133   :  { %v73_v39 = vpop.xlane.xlu1 %72 }
 0x134   :  { %150 = vrsqrt.f32 %v78_v38  ;;  %v75_v40 = vmul.f32 0.00390625, %v73_v39 }
 0x136   :  { %v79_v41 = vadd.f32 1e-08, %v75_v40 }
 0x137   :  { %v115_v49 = vpop.permute.xlu1 %114 }
 0x138   :  { %152 = vrsqrt.f32 %v79_v41  ;;  %v126_v52 = vrot.slane %v115_v49, %v43_v15 }
 0x13e   :  { %v151_v43 = vpop.eup %150 }
 0x13f   :  { %v82_v44 = vmul.f32 %v151_v43, %v76_v42 }
 0x141   :  { %86 = vperm.xlu0 %146, %v82_v44  }
 0x142   :  { %v153_v46 = vpop.eup %152 }
 0x143   :  { %v83_v47 = vmul.f32 %v153_v46, %v77_v45 }
 0x145   :  { %90 = vperm.xlu1 %147, %v83_v47  }
 0x149   :  { %118 = vperm.xlu1 %147, %v111_v48  }
 0x1c0   :  { %v87_v50 = vpop.permute.xlu0 %86 }
 0x1c1   :  { %v98_v51 = vrot.slane %v87_v50, %v43_v15 }
 0x1c3   :  { %v108_v53 = vmul.f32 %v98_v51, %v54_v20 }
 0x1c4   :  { %v91_v54 = vpop.permute.xlu1 %90 }
 0x1c5   :  { %v136_v55 = vadd.f32 %v126_v52, %v108_v53  ;;  %v105_v56 = vrot.slane %v91_v54, %v43_v15 }
 0x1c7   :  { %138 = vst [vmem:[%s211_s3] sm:$0xff] %v136_v55  ;;  %v109_v58 = vmul.f32 %v105_v56, %v55_v24 }
 0x1c8   :  { %v119_v57 = vpop.permute.xlu1 %118 }
 0x1c9   :  { %v133_v59 = vrot.slane %v119_v57, %v43_v15 }
 0x1cb   :  { %v137_v60 = vadd.f32 %v133_v59, %v109_v58 }
 0x1cd   :  { %139 = vst [vmem:[%s211_s3 + $0x8] sm:$0xff] %v137_v60 }

</bundles_post_ra>
